<compile_context>
chip_gen: v7x
topology: tpu7x:2x2x1
jax: 0.10.0
libtpu: 0.0.40
codegen_flags: <defaults>
</compile_context>

<pallas_src>
import functools

import jax
import jax.numpy as jnp
from jax.experimental import pallas as pl
from jax.experimental.pallas import tpu as pltpu

_LANE = 128      # lane (minor) alignment
_SUBLANE = 8     # sublane (second-minor) alignment


def _round_up(n, m):
    return ((n + m - 1) // m) * m


def _pad2d(a, rows, cols):
    return jnp.pad(a, ((0, rows - a.shape[0]), (0, cols - a.shape[1])))


# ---------------------------------------------------------------------------
# Pallas kernel: the whole MADE forward, fused
# ---------------------------------------------------------------------------
def _made_fused_kernel(*refs, acts):
    """refs = (x_ref, wm_0, b_0, wm_1, b_1, ..., wm_{L-1}, b_{L-1}, o_ref).

    wm_i is the pre-masked, pre-transposed weight (in_pad, out_pad);
    b_i is the bias (1, out_pad). `acts` is a static tuple of activations.
    """
    x_ref = refs[0]
    o_ref = refs[-1]
    params = refs[1:-1]

    h = x_ref[...]                                        # (B_pad, in_pad) f32
    for i, act in enumerate(acts):
        wm = params[2 * i][...]                           # (in_pad, out_pad)
        b = params[2 * i + 1][...]                        # (1, out_pad)
        h = jnp.dot(h, wm, preferred_element_type=jnp.float32) + b
        if act == "relu":
            h = jnp.maximum(h, 0.0)
        elif act == "sigmoid":
            h = jax.nn.sigmoid(h)
        # "none" falls through
    o_ref[...] = h.astype(o_ref.dtype)


def made_forward(fused_params, acts, x):
    """Run the fused MADE forward. x: (batch, input_feat) f32. Returns same shape."""
    batch, in_feat = x.shape
    b_pad = _round_up(batch, _SUBLANE)
    in_pad = fused_params[0].shape[0]
    final_pad = fused_params[-2].shape[1]

    x_pad = jnp.pad(x.astype(jnp.float32),
                    ((0, b_pad - batch), (0, in_pad - in_feat)))

    vmem = pl.BlockSpec(memory_space=pltpu.MemorySpace.VMEM)
    out_pad = pl.pallas_call(
        functools.partial(_made_fused_kernel, acts=acts),
        out_shape=jax.ShapeDtypeStruct((b_pad, final_pad), jnp.float32),
        in_specs=[vmem] * (1 + len(fused_params)),
        out_specs=vmem,
    )(x_pad, *fused_params)

    # MADE output width == input_feat; drop batch / lane padding.
    return out_pad[:batch, :in_feat]


# ---------------------------------------------------------------------------
# MADE construction (plain JAX / numpy glue: masks, deterministic parameters)
# ---------------------------------------------------------------------------
def build_mask(m_k, m_k_prev, layer_type):
    """mask[i, j] = 1 if m_k[i] (>|>=) m_k_prev[j], matching MaskedLayer.__init__."""
    m_k = jnp.asarray(m_k)[:, None]            # (out, 1)
    m_k_prev = jnp.asarray(m_k_prev)[None, :]  # (1, in)
    if layer_type == "output":
        return (m_k > m_k_prev).astype(jnp.float32)
    return (m_k >= m_k_prev).astype(jnp.float32)


def init_linear_params(key, in_feat, out_feat):
    """Deterministic PyTorch-Linear-style uniform init (synthetic weights)."""
    kw, kb = jax.random.split(key)
    bound = 1.0 / jnp.sqrt(jnp.asarray(in_feat, jnp.float32))
    w = jax.random.uniform(kw, (out_feat, in_feat), jnp.float32, -bound, bound)
    b = jax.random.uniform(kb, (out_feat,), jnp.float32, -bound, bound)
    return w, b


def build_made(key, input_feat, num_units, num_layer, ordering):
    """Replicates MADE.__init__: connectivity degrees, masks, layer parameters.

    Returns a list of (w, mask, b, activation) in PyTorch layout (out, in).
    """
    D = input_feat - 1
    m_k = [jnp.asarray(ordering, jnp.int32)]
    mk_key = key
    for j in range(num_layer - 1):
        mk_key, sub = jax.random.split(mk_key)
        low = int(jnp.min(m_k[j - 1]))   # same (quirky) m_k[j-1] indexing as the reference
        m_k.append(jax.random.randint(sub, (num_units,), low, D, dtype=jnp.int32))

    layers = []  # list of (w, mask, b, activation)
    pkey = jax.random.fold_in(key, 1000)

    pkey, sub = jax.random.split(pkey)
    w, b = init_linear_params(sub, input_feat, num_units)
    layers.append((w, build_mask(m_k[1], m_k[0], "hidden"), b, "relu"))

    for i in range(2, num_layer):
        pkey, sub = jax.random.split(pkey)
        w, b = init_linear_params(sub, num_units, num_units)
        layers.append((w, build_mask(m_k[i], m_k[i - 1], "hidden"), b, "relu"))

    pkey, sub = jax.random.split(pkey)
    w, b = init_linear_params(sub, num_units, input_feat)
    layers.append((w, build_mask(ordering, m_k[num_layer - 1], "output"), b, "sigmoid"))

    return layers


def fuse_made_params(layers):
    """Fold mask into weight, pre-transpose to (in, out), pre-shape bias, and
    zero-pad feature dims to lane-dense multiples of 128 (done once, offline)."""
    fused = []
    acts = []
    for w, mask, b, act in layers:
        out_f, in_f = w.shape
        in_pad = _round_up(in_f, _LANE)
        out_pad = _round_up(out_f, _LANE)
        wm_t = (w * mask).T                      # (in, out), mask folded in
        fused.append(_pad2d(wm_t, in_pad, out_pad))
        fused.append(_pad2d(b.reshape(1, -1), 1, out_pad))
        acts.append(act)
    return fused, tuple(acts)


# ---------------------------------------------------------------------------
# Reference (pure JAX) for a quick sanity check
# ---------------------------------------------------------------------------
def made_forward_ref(layers, x):
    for w, mask, b, act in layers:
        y = x @ (w * mask).T + b
        if act == "relu":
            y = jnp.maximum(y, 0.0)
        elif act == "sigmoid":
            y = jax.nn.sigmoid(y)
        x = y
    return x


if __name__ == "__main__":
    key = jax.random.PRNGKey(0)

    # Small, MADE-consistent shapes.
    batch = 8
    input_feat = 16
    num_units = 32
    num_layer = 3
    ordering = jnp.arange(input_feat, dtype=jnp.int32)

    k_model, k_input = jax.random.split(key)
    layers = build_made(k_model, input_feat, num_units, num_layer, ordering)
    fused_params, acts = fuse_made_params(layers)

    x = jax.random.uniform(k_input, (batch, input_feat), jnp.float32)

    # Jit the fused forward (params baked as constants; acts are static).
    fwd = jax.jit(functools.partial(made_forward, fused_params, acts))
    out = jax.block_until_ready(fwd(x))

    ref = made_forward_ref(layers, x)
    assert out.shape == (batch, input_feat), out.shape
    assert jnp.allclose(out, ref, atol=1e-5, rtol=1e-5), "mismatch vs reference"

    print("KERNEL_OK")
</pallas_src>

<mosaic_0001>
module attributes {stable_mosaic.version = 11 : i64} {
  func.func @_made_fused_kernel(%arg0: memref<8x128xf32, #tpu.memory_space<vmem>>, %arg1: memref<128x128xf32, #tpu.memory_space<vmem>>, %arg2: memref<1x128xf32, #tpu.memory_space<vmem>>, %arg3: memref<128x128xf32, #tpu.memory_space<vmem>>, %arg4: memref<1x128xf32, #tpu.memory_space<vmem>>, %arg5: memref<128x128xf32, #tpu.memory_space<vmem>>, %arg6: memref<1x128xf32, #tpu.memory_space<vmem>>, %arg7: memref<8x128xf32, #tpu.memory_space<vmem>>) attributes {dimension_semantics = [], scalar_prefetch = 0 : i64, scratch_operands = 0 : i64, tpu.core_type = #tpu.core_type<tc>} {
    %c0 = arith.constant 0 : index
    %c0_0 = arith.constant 0 : index
    %0 = vector.load %arg0[%c0, %c0_0] : memref<8x128xf32, #tpu.memory_space<vmem>>, vector<8x128xf32>
    %c0_1 = arith.constant 0 : index
    %c0_2 = arith.constant 0 : index
    %1 = vector.load %arg1[%c0_1, %c0_2] : memref<128x128xf32, #tpu.memory_space<vmem>>, vector<128x128xf32>
    %c0_3 = arith.constant 0 : index
    %c0_4 = arith.constant 0 : index
    %2 = vector.load %arg2[%c0_3, %c0_4] : memref<1x128xf32, #tpu.memory_space<vmem>>, vector<1x128xf32>
    %cst = arith.constant dense<0.000000e+00> : vector<8x128xf32>
    %3 = tpu.matmul %0, %1, %cst {dimension_numbers = #tpu.dot_dimension_numbers<[1], [0], [0], [1], [0, 0, 1, 1], [], []>} : vector<8x128xf32>, vector<128x128xf32>, vector<8x128xf32> -> vector<8x128xf32>
    %4 = vector.broadcast %2 : vector<1x128xf32> to vector<8x128xf32>
    %5 = arith.addf %3, %4 : vector<8x128xf32>
    %cst_5 = arith.constant 0.000000e+00 : f32
    %6 = vector.broadcast %cst_5 : f32 to vector<8x128xf32>
    %7 = arith.maximumf %5, %6 : vector<8x128xf32>
    %c0_6 = arith.constant 0 : index
    %c0_7 = arith.constant 0 : index
    %8 = vector.load %arg3[%c0_6, %c0_7] : memref<128x128xf32, #tpu.memory_space<vmem>>, vector<128x128xf32>
    %c0_8 = arith.constant 0 : index
    %c0_9 = arith.constant 0 : index
    %9 = vector.load %arg4[%c0_8, %c0_9] : memref<1x128xf32, #tpu.memory_space<vmem>>, vector<1x128xf32>
    %cst_10 = arith.constant dense<0.000000e+00> : vector<8x128xf32>
    %10 = tpu.matmul %7, %8, %cst_10 {dimension_numbers = #tpu.dot_dimension_numbers<[1], [0], [0], [1], [0, 0, 1, 1], [], []>} : vector<8x128xf32>, vector<128x128xf32>, vector<8x128xf32> -> vector<8x128xf32>
    %11 = vector.broadcast %9 : vector<1x128xf32> to vector<8x128xf32>
    %12 = arith.addf %10, %11 : vector<8x128xf32>
    %cst_11 = arith.constant 0.000000e+00 : f32
    %13 = vector.broadcast %cst_11 : f32 to vector<8x128xf32>
    %14 = arith.maximumf %12, %13 : vector<8x128xf32>
    %c0_12 = arith.constant 0 : index
    %c0_13 = arith.constant 0 : index
    %15 = vector.load %arg5[%c0_12, %c0_13] : memref<128x128xf32, #tpu.memory_space<vmem>>, vector<128x128xf32>
    %c0_14 = arith.constant 0 : index
    %c0_15 = arith.constant 0 : index
    %16 = vector.load %arg6[%c0_14, %c0_15] : memref<1x128xf32, #tpu.memory_space<vmem>>, vector<1x128xf32>
    %cst_16 = arith.constant dense<0.000000e+00> : vector<8x128xf32>
    %17 = tpu.matmul %14, %15, %cst_16 {dimension_numbers = #tpu.dot_dimension_numbers<[1], [0], [0], [1], [0, 0, 1, 1], [], []>} : vector<8x128xf32>, vector<128x128xf32>, vector<8x128xf32> -> vector<8x128xf32>
    %18 = vector.broadcast %16 : vector<1x128xf32> to vector<8x128xf32>
    %19 = arith.addf %17, %18 : vector<8x128xf32>
    %20 = arith.negf %19 : vector<8x128xf32>
    %21 = math.exp %20 : vector<8x128xf32>
    %cst_17 = arith.constant 1.000000e+00 : f32
    %22 = vector.broadcast %cst_17 : f32 to vector<8x128xf32>
    %23 = arith.addf %22, %21 : vector<8x128xf32>
    %24 = arith.divf %22, %23 : vector<8x128xf32>
    %c0_18 = arith.constant 0 : index
    %c0_19 = arith.constant 0 : index
    %25 = vector.load %arg7[%c0_18, %c0_19] : memref<8x128xf32, #tpu.memory_space<vmem>>, vector<8x128xf32>
    tpu.vector_store %arg7[%c0_18, %c0_19], %24 {strides = array<i32>} : memref<8x128xf32, #tpu.memory_space<vmem>>, vector<8x128xf32>,
    return
  }
}

</mosaic_0001>

<bundles_post_ra>
// kernel: made_forward.1
= control target key start
LH: loop header
LB: loop body
LE: loop exit
PB: predicated region body
PF: predicated region fallthrough
CT: control target
= control target key end

     0   :  { %12 = vsyncpa [#allocation3], 0  ;;  %s867_s0 = inlined_call_operand.vmem [shape: f32[8,128], index: 0, kind: input, shape index: {}]   ;;  %s868_s1 = inlined_call_operand.hbm [shape: f32[128,128], index: 1, kind: input, shape index: {}]   ;;  %s869_s2 = inlined_call_operand.vmem [shape: f32[1,128], index: 2, kind: input, shape index: {}]   ;;  %s870_s3 = inlined_call_operand.hbm [shape: f32[128,128], index: 3, kind: input, shape index: {}]   ;;  %s871_s4 = inlined_call_operand.vmem [shape: f32[1,128], index: 4, kind: input, shape index: {}]   ;;  %s872_s5 = inlined_call_operand.hbm [shape: f32[128,128], index: 5, kind: input, shape index: {}]   ;;  %s873_s6 = inlined_call_operand.vmem [shape: f32[1,128], index: 6, kind: input, shape index: {}]   ;;  %s874_s7 = inlined_call_operand.hbm [shape: f32[8,128], index: 7, kind: output, shape index: {}]  }
   0x1   :  { %13 = vsyncpa [#allocation6], 0 }
   0x2   :  { %14 = vsyncpa [#allocation4], 0  ;;  %s712_s24 = smov [#allocation5]   ;;  %s713_s26 = smov [#allocation2]  }
   0x3   :  { %s36_s25 = sshll.u32 %s712_s24, 4  ;;  %s22_s27 = sshll.u32 %s713_s26, 4  ;;  %s37_s25 = int_to_ptr.vmem [resolvable:$true] %s36_s25  ;;  %s761_s27 = int_to_ptr.vmem [resolvable:$true] %s22_s27 }
   0x4   :  { %s618_s30 = scalar_lea.hbm %s870_s3, 2048 }
   0x5   :  { %p619_p0 = scmp.ne.s32.totalorder %s870_s3, %s618_s30  ;;  %p622_p1 = scmp.lt.u32.totalorder %s618_s30, %s870_s3 }
   0x7   :  { %p624_p2 = pnand %p622_p1, %p619_p0 }
   0x9   :  { %627 = shalt.err (!%p624_p2)
}
   0xa   :  { %s628_s12 = scalar_lea.vmem %s37_s25, 2048  ;;  %p633_p4 = scmp.lt.s32.totalorder %s37_s25, %s37_s25 }
   0xb   :  { %p629_p3 = scmp.ne.s32.totalorder %s37_s25, %s628_s12  ;;  %p634_p5 = scmp.lt.s32.totalorder %s628_s12, %s628_s12 }
   0xd   :  { %p635_p6 = por %p634_p5, %p633_p4 }
   0xf   :  { %p636_p7 = pnand %p635_p6, %p629_p3 }
  0x11   :  { %639 = shalt.err (!%p636_p7)
}
  0x12   :  { %s714_s13 = smov 128   ;;  %s715_s14 = smov 8  }
  0x13   :  { %42 = dma.hbm_to_vmem [thread:$0]  %s870_s3, 2048, %s37_s25, [#allocation6], %s714_s13, %s714_s13, %s715_s14  }
  0x14   :  { %s640_s19 = scalar_lea.hbm %s868_s1, 2048 }
  0x15   :  { %p641_p8 = scmp.ne.s32.totalorder %s868_s1, %s640_s19  ;;  %p644_p9 = scmp.lt.u32.totalorder %s640_s19, %s868_s1 }
  0x17   :  { %p646_p10 = pnand %p644_p9, %p641_p8 }
  0x19   :  { %649 = shalt.err (!%p646_p10)
}
  0x1a   :  { %s650_s24 = scalar_lea.vmem %s761_s27, 2048  ;;  %p655_p12 = scmp.lt.s32.totalorder %s761_s27, %s761_s27 }
  0x1b   :  { %p651_p11 = scmp.ne.s32.totalorder %s761_s27, %s650_s24  ;;  %p656_p13 = scmp.lt.s32.totalorder %s650_s24, %s650_s24 }
  0x1d   :  { %p657_p0 = por %p656_p13, %p655_p12 }
  0x1f   :  { %p658_p1 = pnand %p657_p0, %p651_p11 }
  0x21   :  { %661 = shalt.err (!%p658_p1)
}
  0x22   :  { %28 = dma.hbm_to_vmem [thread:$0]  %s868_s1, 2048, %s761_s27, [#allocation3], %s714_s13, %s714_s13, %s715_s14  }
  0x23   :  { %s716_s26 = smov [#allocation7]   ;;  %s662_s8 = scalar_lea.hbm %s872_s5, 2048 }
  0x24   :  { %s50_s28 = sshll.u32 %s716_s26, 4  ;;  %p663_p2 = scmp.ne.s32.totalorder %s872_s5, %s662_s8  ;;  %s51_s28 = int_to_ptr.vmem [resolvable:$true] %s50_s28 }
  0x25   :  { %p666_p3 = scmp.lt.u32.totalorder %s662_s8, %s872_s5 }
  0x27   :  { %p668_p4 = pnand %p666_p3, %p663_p2 }
  0x29   :  { %671 = shalt.err (!%p668_p4)
}
  0x2a   :  { %s672_s15 = scalar_lea.vmem %s51_s28, 2048  ;;  %p677_p6 = scmp.lt.s32.totalorder %s51_s28, %s51_s28 }
  0x2b   :  { %p673_p5 = scmp.ne.s32.totalorder %s51_s28, %s672_s15  ;;  %p678_p7 = scmp.lt.s32.totalorder %s672_s15, %s672_s15 }
  0x2d   :  { %p679_p8 = por %p678_p7, %p677_p6 }
  0x2f   :  { %p680_p9 = pnand %p679_p8, %p673_p5 }
  0x31   :  { %683 = shalt.err (!%p680_p9)
}
  0x32   :  { %56 = dma.hbm_to_vmem [thread:$0]  %s872_s5, 2048, %s51_s28, [#allocation6], %s714_s13, %s714_s13, %s715_s14  }
  0x33   :  { %706 = dma.done.wait [#allocation3], 2048  }
  0x34   :  { %707 = vsyncadd [#allocation3], 4294965248 }
  0x35   :  { %708 = dma.done.wait [#allocation6], 4096  }
  0x36   :  { %709 = vsyncadd [#allocation6], 4294963200  ;;  %v717_v0 = vmov 0.0|0.0   ;;  %vm718_vm0 = vmmov 0   ;;  %v719_v1 = vmov 0.0   ;;  %v69_v2 = vld [vmem:[#allocation2] sm:$0xff] }
  0x37   :  { %533 = vmatprep.subr.bf16.mxu0 %v717_v0  ;;  %460 = vmatprep.mubr.msk.f32.mxu0 %vm718_vm0, %v719_v1  ;;  %v70_v3 = vld [vmem:[#allocation2 + $0x8] sm:$0xff]  ;;  %v71_v4 = vld [vmem:[#allocation2 + $0x10] sm:$0xff]  ;;  %v72_v6 = vld [vmem:[#allocation2 + $0x18] sm:$0xff]  ;;  %s720_s19 = smov [#allocation8]  }
  0x38   :  { %557 = vmatprep.subr.bf16.mxu1 %v717_v0  ;;  %495 = vmatprep.mubr.msk.f32.mxu1 %vm718_vm0, %v719_v1  ;;  %v534_v5 = vpack.c.bf16 %v70_v3, %v69_v2  ;;  %v537_v7 = vpack.c.bf16 %v72_v6, %v71_v4  ;;  %v73_v8 = vld [vmem:[#allocation2 + $0x20] sm:$0xff]  ;;  %v74_v9 = vld [vmem:[#allocation2 + $0x28] sm:$0xff]  ;;  %v165_v12 = vld [vmem:[#allocation5 + $0x10] sm:$0xff]  ;;  %s363_s20 = sshll.u32 %s720_s19, 4  ;;  %s364_s20 = int_to_ptr.vmem [resolvable:$true] %s363_s20 }
  0x39   :  { %v163_v10 = vld [vmem:[#allocation5] sm:$0xff]  ;;  %v164_v11 = vld [vmem:[#allocation5 + $0x8] sm:$0xff]  ;;  %v166_v13 = vld [vmem:[#allocation5 + $0x18] sm:$0xff]  ;;  %v540_v14 = vpack.c.bf16 %v74_v9, %v73_v8  ;;  %p689_p11 = scmp.lt.s32.totalorder %s364_s20, %s364_s20 }
  0x3a   :  { %535 = vmatpush3.bf16.msra.mxu0 %v534_v5  ;;  %v558_v15 = vpack.c.bf16 %v164_v11, %v163_v10  ;;  %v75_v16 = vld [vmem:[#allocation2 + $0x30] sm:$0xff]  ;;  %v76_v17 = vld [vmem:[#allocation2 + $0x38] sm:$0xff]  ;;  %v561_v18 = vpack.c.bf16 %v166_v13, %v165_v12  ;;  %v167_v19 = vld [vmem:[#allocation5 + $0x20] sm:$0xff] }
  0x3b   :  { %536 = vmatprep.subr.bf16.mxu0 %v717_v0  ;;  %v168_v20 = vld [vmem:[#allocation5 + $0x28] sm:$0xff]  ;;  %v543_v21 = vpack.c.bf16 %v76_v17, %v75_v16  ;;  %v77_v22 = vld [vmem:[#allocation2 + $0x40] sm:$0xff]  ;;  %v169_v25 = vld [vmem:[#allocation5 + $0x30] sm:$0xff] }
  0x3c   :  { %559 = vmatpush3.bf16.msra.mxu1 %v558_v15  ;;  %v78_v23 = vld [vmem:[#allocation2 + $0x48] sm:$0xff]  ;;  %v564_v24 = vpack.c.bf16 %v168_v20, %v167_v19  ;;  %v170_v26 = vld [vmem:[#allocation5 + $0x38] sm:$0xff]  ;;  %v79_v28 = vld [vmem:[#allocation2 + $0x50] sm:$0xff] }
  0x3d   :  { %560 = vmatprep.subr.bf16.mxu1 %v717_v0  ;;  %v546_v27 = vpack.c.bf16 %v78_v23, %v77_v22  ;;  %v80_v29 = vld [vmem:[#allocation2 + $0x58] sm:$0xff]  ;;  %v567_v30 = vpack.c.bf16 %v170_v26, %v169_v25  ;;  %v171_v31 = vld [vmem:[#allocation5 + $0x40] sm:$0xff]  ;;  %v172_v32 = vld [vmem:[#allocation5 + $0x48] sm:$0xff] }
  0x3e   :  { %538 = vmatpush3.bf16.msra.mxu0 %v537_v7  ;;  %v549_v33 = vpack.c.bf16 %v80_v29, %v79_v28  ;;  %v81_v34 = vld [vmem:[#allocation2 + $0x60] sm:$0xff]  ;;  %v82_v35 = vld [vmem:[#allocation2 + $0x68] sm:$0xff]  ;;  %v570_v36 = vpack.c.bf16 %v172_v32, %v171_v31  ;;  %v173_v37 = vld [vmem:[#allocation5 + $0x50] sm:$0xff] }
  0x3f   :  { %539 = vmatprep.subr.bf16.mxu0 %v717_v0  ;;  %v174_v38 = vld [vmem:[#allocation5 + $0x58] sm:$0xff]  ;;  %v552_v39 = vpack.c.bf16 %v82_v35, %v81_v34  ;;  %v83_v40 = vld [vmem:[#allocation2 + $0x70] sm:$0xff]  ;;  %v175_v43 = vld [vmem:[#allocation5 + $0x60] sm:$0xff] }
  0x40   :  { %562 = vmatpush3.bf16.msra.mxu1 %v561_v18  ;;  %v84_v41 = vld [vmem:[#allocation2 + $0x78] sm:$0xff]  ;;  %v573_v42 = vpack.c.bf16 %v174_v38, %v173_v37  ;;  %v176_v44 = vld [vmem:[#allocation5 + $0x68] sm:$0xff]  ;;  %v68_v47 = vld [vmem:[%s867_s0] sm:$0xff] }
  0x41   :  { %563 = vmatprep.subr.bf16.mxu1 %v717_v0  ;;  %v555_v45 = vpack.c.bf16 %v84_v41, %v83_v40  ;;  %v576_v46 = vpack.c.bf16 %v176_v44, %v175_v43  ;;  %v177_v48 = vld [vmem:[#allocation5 + $0x70] sm:$0xff]  ;;  %v178_v49 = vld [vmem:[#allocation5 + $0x78] sm:$0xff]  ;;  %v257_v51 = vld [vmem:[#allocation7] sm:$0xff] }
  0x42   :  { %541 = vmatpush3.bf16.msra.mxu0 %v540_v14  ;;  %v579_v50 = vpack.c.bf16 %v178_v49, %v177_v48  ;;  %v258_v52 = vld [vmem:[#allocation7 + $0x8] sm:$0xff]  ;;  %v259_v53 = vld [vmem:[#allocation7 + $0x10] sm:$0xff]  ;;  %v260_v55 = vld [vmem:[#allocation7 + $0x18] sm:$0xff] }
  0x43   :  { %542 = vmatprep.subr.bf16.mxu0 %v717_v0  ;;  %v582_v54 = vpack.c.bf16 %v258_v52, %v257_v51  ;;  %v585_v56 = vpack.c.bf16 %v260_v55, %v259_v53  ;;  %v261_v57 = vld [vmem:[#allocation7 + $0x20] sm:$0xff]  ;;  %v262_v58 = vld [vmem:[#allocation7 + $0x28] sm:$0xff]  ;;  %v263_v60 = vld [vmem:[#allocation7 + $0x30] sm:$0xff] }
  0x44   :  { %565 = vmatpush3.bf16.msra.mxu1 %v564_v24  ;;  %v588_v59 = vpack.c.bf16 %v262_v58, %v261_v57  ;;  %v264_v61 = vld [vmem:[#allocation7 + $0x38] sm:$0xff]  ;;  %v265_v63 = vld [vmem:[#allocation7 + $0x40] sm:$0xff]  ;;  %v267_v3 = vld [vmem:[#allocation7 + $0x50] sm:$0xff] }
  0x45   :  { %566 = vmatprep.subr.bf16.mxu1 %v717_v0  ;;  %v591_v62 = vpack.c.bf16 %v264_v61, %v263_v60  ;;  %v268_v4 = vld [vmem:[#allocation7 + $0x58] sm:$0xff]  ;;  %v269_v6 = vld [vmem:[#allocation7 + $0x60] sm:$0xff]  ;;  %v270_v7 = vld [vmem:[#allocation7 + $0x68] sm:$0xff] }
  0x46   :  { %544 = vmatpush3.bf16.msra.mxu0 %v543_v21  ;;  %v597_v5 = vpack.c.bf16 %v268_v4, %v267_v3  ;;  %v600_v8 = vpack.c.bf16 %v270_v7, %v269_v6  ;;  %v373_v9 = vld [vmem:[%s869_s2] ss:$0 sm:$0xff]  ;;  %v271_v14 = vld [vmem:[#allocation7 + $0x70] sm:$0xff]  ;;  %v272_v15 = vld [vmem:[#allocation7 + $0x78] sm:$0xff] }
  0x47   :  { %545 = vmatprep.subr.bf16.mxu0 %v717_v0  ;;  %v603_v16 = vpack.c.bf16 %v272_v15, %v271_v14  ;;  %v374_v17 = vld [vmem:[%s871_s4] ss:$0 sm:$0xff]  ;;  %s684_s4 = scalar_lea.vmem %s364_s20, 128 }
  0x48   :  { %568 = vmatpush3.bf16.msra.mxu1 %v567_v30  ;;  %v375_v21 = vld [vmem:[%s873_s6] ss:$0 sm:$0xff]  ;;  %p685_p10 = scmp.ne.s32.totalorder %s364_s20, %s684_s4  ;;  %p690_p12 = scmp.lt.s32.totalorder %s684_s4, %s684_s4 }
  0x49   :  { %569 = vmatprep.subr.bf16.mxu1 %v717_v0 }
  0x4a   :  { %547 = vmatpush3.bf16.msra.mxu0 %v546_v27  ;;  %p691_p13 = por %p690_p12, %p689_p11 }
  0x4b   :  { %548 = vmatprep.subr.bf16.mxu0 %v717_v0 }
  0x4c   :  { %571 = vmatpush3.bf16.msra.mxu1 %v570_v36  ;;  %p692_p0 = pnand %p691_p13, %p685_p10 }
  0x4d   :  { %572 = vmatprep.subr.bf16.mxu1 %v717_v0 }
  0x4e   :  { %550 = vmatpush3.bf16.msra.mxu0 %v549_v33 }
  0x4f   :  { %551 = vmatprep.subr.bf16.mxu0 %v717_v0 }
  0x50   :  { %574 = vmatpush3.bf16.msra.mxu1 %v573_v42 }
  0x51   :  { %575 = vmatprep.subr.bf16.mxu1 %v717_v0 }
  0x52   :  { %553 = vmatpush3.bf16.msra.mxu0 %v552_v39 }
  0x53   :  { %554 = vmatprep.subr.bf16.mxu0 %v717_v0 }
  0x54   :  { %577 = vmatpush3.bf16.msra.mxu1 %v576_v46 }
  0x55   :  { %578 = vmatprep.subr.bf16.mxu1 %v717_v0 }
  0x56   :  { %556 = vmatpush3.bf16.msra.mxu0 %v555_v45 }
  0x57   :  { %581 = vmatprep.subr.bf16.mxu0 %v717_v0 }
  0x58   :  { %580 = vmatpush3.bf16.msra.mxu1 %v579_v50 }
  0x59   :  { %461 = vmatmul.mubr.f32.vlgmr.msra.gmra.mrb[0].mxu0 %v68_v47 }
  0x5a   :  { %530 = vmatprep.mubr.msk.f32.mxu0 %vm718_vm0, %v719_v1  ;;  %583 = vmatpush3.bf16.msra.mxu0 %v582_v54  ;;  %v266_v1 = vld [vmem:[#allocation7 + $0x48] sm:$0xff] }
  0x5b   :  { %584 = vmatprep.subr.bf16.mxu0 %v717_v0  ;;  %v594_v2 = vpack.c.bf16 %v266_v1, %v265_v63 }
  0x5e   :  { %586 = vmatpush3.bf16.msra.mxu0 %v585_v56 }
  0x5f   :  { %587 = vmatprep.subr.bf16.mxu0 %v717_v0 }
  0x62   :  { %589 = vmatpush3.bf16.msra.mxu0 %v588_v59 }
  0x63   :  { %590 = vmatprep.subr.bf16.mxu0 %v717_v0 }
  0x66   :  { %592 = vmatpush3.bf16.msra.mxu0 %v591_v62 }
  0x67   :  { %593 = vmatprep.subr.bf16.mxu0 %v717_v0 }
  0x6a   :  { %595 = vmatpush3.bf16.msra.mxu0 %v594_v2 }
  0x6b   :  { %596 = vmatprep.subr.bf16.mxu0 %v717_v0 }
  0x6e   :  { %598 = vmatpush3.bf16.msra.mxu0 %v597_v5 }
  0x6f   :  { %599 = vmatprep.subr.bf16.mxu0 %v717_v0 }
  0x72   :  { %601 = vmatpush3.bf16.msra.mxu0 %v600_v8 }
  0x73   :  { %602 = vmatprep.subr.bf16.mxu0 %v717_v0 }
  0x76   :  { %604 = vmatpush3.bf16.msra.mxu0 %v603_v16 }
 0x12c   :  { %v158_v10 = vpop.f32.mrb[0].mxu0 }
 0x12d   :  { %v159_v11 = vadd.f32 %v373_v9, %v158_v10  ;;  %v462_v12 = vpop.f32.mrb[1].mxu0 }
 0x12f   :  { %v162_v13 = vmax.f32 %v159_v11, 0.0 }
 0x131   :  { %496 = vmatmul.mubr.f32.vlgmr.msra.gmra.mrb[0].mxu1 %v162_v13 }
 0x204   :  { %v252_v18 = vpop.f32.mrb[0].mxu1 }
 0x205   :  { %v253_v19 = vadd.f32 %v374_v17, %v252_v18  ;;  %v497_v0 = vpop.f32.mrb[1].mxu1 }
 0x207   :  { %v256_v20 = vmax.f32 %v253_v19, 0.0 }
 0x209   :  { %531 = vmatmul.mubr.f32.vlgmr.msra.gmra.mrb[2].mxu0 %v256_v20 }
 0x2dc   :  { %v346_v22 = vpop.f32.mrb[2].mxu0 }
 0x2dd   :  { %v347_v23 = vadd.f32 %v375_v21, %v346_v22  ;;  %v532_v24 = vpop.f32.mrb[3].mxu0 }
 0x2df   :  { %v376_v25 = vmul.f32 -1.442695, %v347_v23 }
 0x2e1   :  { %614 = vpow2.f32 %v376_v25 }
 0x2eb   :  { %v615_v26 = vpop.eup %614 }
 0x2ec   :  { %v353_v27 = vadd.f32 1.0, %v615_v26 }
 0x2ee   :  { %616 = vrcp.f32 %v353_v27 }
 0x2f8   :  { %v617_v28 = vpop.eup %616 }
 0x2f9   :  { %356 = vst [vmem:[#allocation8] sm:$0xff] %v617_v28 }
 0x2fa   :  { %695 = shalt.err (!%p692_p0)
}
 0x2fb   :  { %s696_s22 = scalar_lea.hbm %s874_s7, 128 }
 0x2fc   :  { %p697_p1 = scmp.ne.s32.totalorder %s874_s7, %s696_s22  ;;  %p700_p2 = scmp.lt.u32.totalorder %s696_s22, %s874_s7 }
 0x2fe   :  { %p702_p3 = pnand %p700_p2, %p697_p1 }
 0x300   :  { %705 = shalt.err (!%p702_p3)
}
 0x301   :  { %366 = dma.vmem_to_hbm [thread:$0]  %s364_s20, 128, %s874_s7, [#allocation4]  }
 0x302   :  { %710 = dma.done.wait [#allocation4], 128  }
 0x303   :  { %711 = vsyncadd [#allocation4], 4294967168 }
 0x304   :  { %370 = vsyncpa [#allocation3], 1 }
 0x305   :  { %371 = vsyncpa [#allocation6], 1 }
 0x306   :  { %372 = vsyncpa [#allocation4], 1 }

</bundles_post_ra>
